<compile_context>
chip_gen: v7x
topology: tpu7x:2x2x1
jax: 0.10.0
libtpu: 0.0.40
codegen_flags: <defaults>
</compile_context>

<pallas_src>
import functools

import jax
import jax.numpy as jnp
from jax.experimental import pallas as pl
from jax.experimental.pallas import tpu as pltpu


def _round_up(x, m):
    return ((x + m - 1) // m) * m


def _critic_kernel(s_ref, w1_ref, b1_ref, w2_ref, b2_ref, w3_ref, b3_ref,
                   out_ref, *, compute_dtype):
    # fc1 + ReLU: MXU matmul, f32 accumulation; bias/ReLU in f32 on the VPU.
    # Weights already arrive in compute_dtype (cast once in the wrapper).
    x = s_ref[...].astype(compute_dtype)
    h1 = jnp.dot(x, w1_ref[...], preferred_element_type=jnp.float32)
    # Fuse the down-cast into the ReLU so the live (tb, H) intermediate that
    # feeds fc2 is half-width (halves vreg/VMEM spill + vst traffic).
    h1 = jnp.maximum(h1 + b1_ref[...], 0.0).astype(compute_dtype)

    # fc2 + ReLU (kept in f32 after the accumulate; it only feeds the VPU head).
    h2 = jnp.dot(h1, w2_ref[...], preferred_element_type=jnp.float32)
    h2 = jnp.maximum(h2 + b2_ref[...], 0.0)

    # value head (H -> 1): VPU multiply + XLU cross-lane reduce; keeps the MXU free.
    w3 = w3_ref[...].astype(jnp.float32)                  # (1, H) row
    v = jnp.sum(h2 * w3, axis=-1)                         # (tb,)
    v = v.reshape(1, -1) + b3_ref[0, 0]                   # lane-dense (1, tb)
    out_ref[...] = v.astype(out_ref.dtype)


def critic_forward(state, params, *, batch_tile=None, compute_dtype=jnp.bfloat16):
    """Fused critic MLP. state: (B, state_dim) f32 -> (B, 1) f32.

    compute_dtype is the MXU input dtype (bf16 fast path by default on
    v5e/v6e/v7x); accumulation, bias adds and ReLU are always f32.
    """
    w1, b1, w2, b2, w3, b3 = params
    B, S = state.shape
    H = w2.shape[0]

    # Cast weights ONCE here (not per grid step inside the kernel).
    w1c = w1.astype(compute_dtype)
    w2c = w2.astype(compute_dtype)
    w3c = w3.astype(compute_dtype)
    b3s = b3.reshape(1, 1).astype(jnp.float32)            # scalar -> SMEM

    # Batch tiling: 128-aligned tiles (lane-dense unmasked output stores);
    # >= 2 tiles once B >= 256 so the v7x megacore can shard the batch.
    if batch_tile is None:
        b128 = _round_up(B, 128)
        tb = b128 if b128 <= 128 else min(512, _round_up(b128 // 2, 128))
    else:
        tb = batch_tile                                    # keep >=256 on v6e/v7x for big B
    assert tb % 8 == 0, "batch_tile must be a multiple of 8 (f32 sublane tiling)"
    B_pad = _round_up(B, tb)
    grid_n = B_pad // tb
    assert grid_n == 1 or tb % 128 == 0, (
        "multi-tile grids need a 128-multiple batch_tile for the lane-dense output")

    if B_pad != B:
        # NOTE: padded rows run through bias+ReLU and hold garbage; they are
        # sliced off below and must never be consumed directly.
        state = jnp.pad(state, ((0, B_pad - B), (0, 0)))

    kernel = functools.partial(_critic_kernel, compute_dtype=compute_dtype)

    # Resident (grid-constant) blocks: single-buffer them.
    def resident(arr):
        return pl.BlockSpec(arr.shape, lambda i: (0, 0),
                            pipeline_mode=pl.Buffered(1))

    # Explicit VMEM budget with headroom (v5e scoped default is only 16 MiB).
    def _nbytes(a):
        return int(a.size) * a.dtype.itemsize

    weight_bytes = sum(_nbytes(a) for a in (w1c, b1, w2c, b2, w3c))
    stream_bytes = 2 * (tb * S * state.dtype.itemsize + tb * 4)   # 2x-buffered io
    interm_bytes = 4 * tb * max(H, 128) * 4                       # h1/h2 + spill headroom
    vmem_limit = min(max(2 * (weight_bytes + stream_bytes + interm_bytes),
                         32 << 20), 64 << 20)

    cost = pl.CostEstimate(
        flops=int(2 * B_pad * (S * H + H * H + H)),
        transcendentals=0,
        bytes_accessed=int(B_pad * S * 4 + weight_bytes + B_pad * 4),
    )

    out = pl.pallas_call(
        kernel,
        out_shape=jax.ShapeDtypeStruct((1, B_pad), jnp.float32),
        grid=(grid_n,),
        in_specs=[
            pl.BlockSpec((tb, S), lambda i: (i, 0)),               # state tile (pipelined)
            resident(w1c), resident(b1),                           # fc1 (resident, 1 buffer)
            resident(w2c), resident(b2),                           # fc2 (resident, 1 buffer)
            resident(w3c),                                         # value-head row
            pl.BlockSpec(memory_space=pltpu.MemorySpace.SMEM),     # b3 scalar in SMEM
        ],
        out_specs=pl.BlockSpec((1, tb), lambda i: (0, i)),         # lane-dense slab
        compiler_params=pltpu.CompilerParams(
            dimension_semantics=("parallel",),
            vmem_limit_bytes=int(vmem_limit)),
        cost_estimate=cost,
    )(state, w1c, b1, w2c, b2, w3c, b3s)

    # Layout plumbing back to the PyTorch (B, 1) shape (free, outside kernel).
    return out.reshape(B_pad, 1)[:B]


def init_params(key, state_dim, hidden_dim):
    """PyTorch-style uniform(+-1/sqrt(fan_in)) init, kernel-friendly (in, out) layout."""
    ks = jax.random.split(key, 6)

    def linear(kw, kb, fan_in, fan_out):
        bound = 1.0 / jnp.sqrt(jnp.float32(fan_in))
        w = jax.random.uniform(kw, (fan_in, fan_out), jnp.float32, -bound, bound)
        b = jax.random.uniform(kb, (1, fan_out), jnp.float32, -bound, bound)
        return w, b

    w1, b1 = linear(ks[0], ks[1], state_dim, hidden_dim)
    w2, b2 = linear(ks[2], ks[3], hidden_dim, hidden_dim)
    w3_col, b3 = linear(ks[4], ks[5], hidden_dim, 1)
    w3 = w3_col.T                        # value-head weight kept as a (1, H) row
    return (w1, b1, w2, b2, w3, b3)


def critic_reference(state, params):
    """Pure-JAX reference of the PyTorch forward pass (high-precision dots)."""
    w1, b1, w2, b2, w3, b3 = params
    dot = functools.partial(jnp.dot, precision=jax.lax.Precision.HIGHEST)
    x = jnp.maximum(dot(state, w1) + b1, 0.0)
    x = jnp.maximum(dot(x, w2) + b2, 0.0)
    return dot(x, w3.T) + b3


if __name__ == "__main__":
    key = jax.random.PRNGKey(0)
    k_param, k_state = jax.random.split(key)

    batch, state_dim, hidden_dim = 8, 16, 128   # hidden_dim = module default
    params = init_params(k_param, state_dim, hidden_dim)
    state = jax.random.normal(k_state, (batch, state_dim), jnp.float32)
    ref = critic_reference(state, params)

    # bf16-MXU fast path (default): f32 accumulation, loose tolerance.
    value = jax.block_until_ready(critic_forward(state, params))
    assert value.shape == (batch, 1)
    assert jnp.allclose(value, ref, atol=1e-1, rtol=1e-1)

    # f32 path: close parity with the pure-JAX reference.
    value_f32 = jax.block_until_ready(
        critic_forward(state, params, compute_dtype=jnp.float32))
    assert value_f32.shape == (batch, 1)
    assert jnp.allclose(value_f32, ref, atol=1e-2, rtol=1e-2)

    # Multi-tile (grid_n >= 2) path with batch padding — exercises the
    # megacore-parallel batch split and the wrapper-side slice.
    batch2 = 384
    state2 = jax.random.normal(jax.random.PRNGKey(1), (batch2, state_dim), jnp.float32)
    ref2 = critic_reference(state2, params)
    value2 = jax.block_until_ready(critic_forward(state2, params))
    assert value2.shape == (batch2, 1)
    assert jnp.allclose(value2, ref2, atol=1e-1, rtol=1e-1)

    print("KERNEL_OK")
</pallas_src>

<mosaic_0001>
module attributes {stable_mosaic.version = 11 : i64} {
  func.func @_critic_kernel(%arg0: i32, %arg1: memref<128x16xf32, #tpu.memory_space<vmem>>, %arg2: memref<16x128xbf16, #tpu.memory_space<vmem>>, %arg3: memref<1x128xf32, #tpu.memory_space<vmem>>, %arg4: memref<128x128xbf16, #tpu.memory_space<vmem>>, %arg5: memref<1x128xf32, #tpu.memory_space<vmem>>, %arg6: memref<1x128xbf16, #tpu.memory_space<vmem>>, %arg7: memref<1x1xf32, #tpu.memory_space<smem>>, %arg8: memref<1x128xf32, #tpu.memory_space<vmem>>) attributes {dimension_semantics = [#tpu.dimension_semantics<parallel>], iteration_bounds = array<i64: 1>, scalar_prefetch = 0 : i64, scratch_operands = 0 : i64, tpu.core_type = #tpu.core_type<tc>, window_params = [{transform_indices = @transform_0, window_bounds = array<i64: 128, 16>}, {pipeline_mode = #tpu.pipeline_mode<synchronous>, transform_indices = @transform_1, window_bounds = array<i64: 16, 128>}, {pipeline_mode = #tpu.pipeline_mode<synchronous>, transform_indices = @transform_2, window_bounds = array<i64: 1, 128>}, {pipeline_mode = #tpu.pipeline_mode<synchronous>, transform_indices = @transform_3, window_bounds = array<i64: 128, 128>}, {pipeline_mode = #tpu.pipeline_mode<synchronous>, transform_indices = @transform_4, window_bounds = array<i64: 1, 128>}, {pipeline_mode = #tpu.pipeline_mode<synchronous>, transform_indices = @transform_5, window_bounds = array<i64: 1, 128>}, {transform_indices = @transform_6, window_bounds = array<i64: 1, 1>}, {transform_indices = @transform_7, window_bounds = array<i64: 1, 128>}]} {
    %c0 = arith.constant 0 : index
    %c0_0 = arith.constant 0 : index
    %0 = vector.load %arg1[%c0, %c0_0] : memref<128x16xf32, #tpu.memory_space<vmem>>, vector<128x16xf32>
    %1 = arith.truncf %0 : vector<128x16xf32> to vector<128x16xbf16>
    %c0_1 = arith.constant 0 : index
    %c0_2 = arith.constant 0 : index
    %2 = vector.load %arg2[%c0_1, %c0_2] : memref<16x128xbf16, #tpu.memory_space<vmem>>, vector<16x128xbf16>
    %cst = arith.constant dense<0.000000e+00> : vector<128x128xf32>
    %3 = tpu.matmul %1, %2, %cst {dimension_numbers = #tpu.dot_dimension_numbers<[1], [0], [0], [1], [0, 0, 1, 1], [], []>} : vector<128x16xbf16>, vector<16x128xbf16>, vector<128x128xf32> -> vector<128x128xf32>
    %c0_3 = arith.constant 0 : index
    %c0_4 = arith.constant 0 : index
    %4 = vector.load %arg3[%c0_3, %c0_4] : memref<1x128xf32, #tpu.memory_space<vmem>>, vector<1x128xf32>
    %5 = vector.broadcast %4 : vector<1x128xf32> to vector<128x128xf32>
    %6 = arith.addf %3, %5 : vector<128x128xf32>
    %cst_5 = arith.constant 0.000000e+00 : f32
    %7 = vector.broadcast %cst_5 : f32 to vector<128x128xf32>
    %8 = arith.maximumf %6, %7 : vector<128x128xf32>
    %9 = arith.truncf %8 : vector<128x128xf32> to vector<128x128xbf16>
    %c0_6 = arith.constant 0 : index
    %c0_7 = arith.constant 0 : index
    %10 = vector.load %arg4[%c0_6, %c0_7] : memref<128x128xbf16, #tpu.memory_space<vmem>>, vector<128x128xbf16>
    %cst_8 = arith.constant dense<0.000000e+00> : vector<128x128xf32>
    %11 = tpu.matmul %9, %10, %cst_8 {dimension_numbers = #tpu.dot_dimension_numbers<[1], [0], [0], [1], [0, 0, 1, 1], [], []>} : vector<128x128xbf16>, vector<128x128xbf16>, vector<128x128xf32> -> vector<128x128xf32>
    %c0_9 = arith.constant 0 : index
    %c0_10 = arith.constant 0 : index
    %12 = vector.load %arg5[%c0_9, %c0_10] : memref<1x128xf32, #tpu.memory_space<vmem>>, vector<1x128xf32>
    %13 = vector.broadcast %12 : vector<1x128xf32> to vector<128x128xf32>
    %14 = arith.addf %11, %13 : vector<128x128xf32>
    %cst_11 = arith.constant 0.000000e+00 : f32
    %15 = vector.broadcast %cst_11 : f32 to vector<128x128xf32>
    %16 = arith.maximumf %14, %15 : vector<128x128xf32>
    %c0_12 = arith.constant 0 : index
    %c0_13 = arith.constant 0 : index
    %17 = vector.load %arg6[%c0_12, %c0_13] : memref<1x128xbf16, #tpu.memory_space<vmem>>, vector<1x128xbf16>
    %18 = arith.extf %17 : vector<1x128xbf16> to vector<1x128xf32>
    %19 = vector.broadcast %18 : vector<1x128xf32> to vector<128x128xf32>
    %20 = arith.mulf %16, %19 : vector<128x128xf32>
    %cst_14 = arith.constant dense<0.000000e+00> : vector<128xf32>
    %21 = vector.multi_reduction <add>, %20, %cst_14 [1] : vector<128x128xf32> to vector<128xf32>
    %22 = vector.shape_cast %21 : vector<128xf32> to vector<1x128xf32>
    %c0_15 = arith.constant 0 : index
    %c0_16 = arith.constant 0 : index
    %23 = memref.load %arg7[%c0_15, %c0_16] : memref<1x1xf32, #tpu.memory_space<smem>>
    %24 = vector.broadcast %23 : f32 to vector<1x128xf32>
    %25 = arith.addf %22, %24 : vector<1x128xf32>
    %c0_17 = arith.constant 0 : index
    %c0_18 = arith.constant 0 : index
    %26 = vector.load %arg8[%c0_17, %c0_18] : memref<1x128xf32, #tpu.memory_space<vmem>>, vector<1x128xf32>
    tpu.vector_store %arg8[%c0_17, %c0_18], %25 {strides = array<i32>} : memref<1x128xf32, #tpu.memory_space<vmem>>, vector<1x128xf32>,
    return
  }
  func.func @transform_0(%arg0: i32) -> (i32, i32) {
    %c0_i32 = arith.constant 0 : i32
    %c0_i32_0 = arith.constant 0 : i32
    return %arg0, %c0_i32 : i32, i32
  }
  func.func @transform_1(%arg0: i32) -> (i32, i32) {
    %c0_i32 = arith.constant 0 : i32
    %c0_i32_0 = arith.constant 0 : i32
    %c0_i32_1 = arith.constant 0 : i32
    return %c0_i32, %c0_i32_0 : i32, i32
  }
  func.func @transform_2(%arg0: i32) -> (i32, i32) {
    %c0_i32 = arith.constant 0 : i32
    %c0_i32_0 = arith.constant 0 : i32
    %c0_i32_1 = arith.constant 0 : i32
    return %c0_i32, %c0_i32_0 : i32, i32
  }
  func.func @transform_3(%arg0: i32) -> (i32, i32) {
    %c0_i32 = arith.constant 0 : i32
    %c0_i32_0 = arith.constant 0 : i32
    %c0_i32_1 = arith.constant 0 : i32
    return %c0_i32, %c0_i32_0 : i32, i32
  }
  func.func @transform_4(%arg0: i32) -> (i32, i32) {
    %c0_i32 = arith.constant 0 : i32
    %c0_i32_0 = arith.constant 0 : i32
    %c0_i32_1 = arith.constant 0 : i32
    return %c0_i32, %c0_i32_0 : i32, i32
  }
  func.func @transform_5(%arg0: i32) -> (i32, i32) {
    %c0_i32 = arith.constant 0 : i32
    %c0_i32_0 = arith.constant 0 : i32
    %c0_i32_1 = arith.constant 0 : i32
    return %c0_i32, %c0_i32_0 : i32, i32
  }
  func.func @transform_6(%arg0: i32) -> (i32, i32) {
    %c0_i32 = arith.constant 0 : i32
    %c0_i32_0 = arith.constant 0 : i32
    %c0_i32_1 = arith.constant 0 : i32
    return %c0_i32, %c0_i32_0 : i32, i32
  }
  func.func @transform_7(%arg0: i32) -> (i32, i32) {
    %c0_i32 = arith.constant 0 : i32
    %c0_i32_0 = arith.constant 0 : i32
    return %c0_i32, %arg0 : i32, i32
  }
}

</mosaic_0001>

<bundles_post_ra>
// kernel: tpu_custom_call.1
= control target key start
LH: loop header
LB: loop body
LE: loop exit
PB: predicated region body
PF: predicated region fallthrough
CT: control target
= control target key end

     0   :  { %vm68_vm0 = vcmask 130048   ;;  %s1002_s0 = inlined_call_operand.vmem [shape: f32[128,16], index: 0, kind: input, shape index: {}]   ;;  %s1003_s1 = inlined_call_operand.vmem [shape: bf16[16,128], index: 1, kind: input, shape index: {}]   ;;  %s1004_s2 = inlined_call_operand.vmem [shape: f32[1,128], index: 2, kind: input, shape index: {}]   ;;  %s1005_s3 = inlined_call_operand.vmem [shape: bf16[128,128], index: 3, kind: input, shape index: {}]   ;;  %s1006_s4 = inlined_call_operand.vmem [shape: f32[1,128], index: 4, kind: input, shape index: {}]   ;;  %s1007_s5 = inlined_call_operand.vmem [shape: bf16[1,128], index: 5, kind: input, shape index: {}]   ;;  %s1008_s6 = inlined_call_operand.<no memory space> [shape: f32[1,1], index: 6, kind: input, shape index: {}]   ;;  %s1009_s7 = inlined_call_operand.hbm [shape: f32[1,128], index: 7, kind: output, shape index: {}]  }
   0x1   :  { %v724_v0 = vld [vmem:[%s1003_s1] sm:$0xff]   ;;  %v30_v2 = vld [vmem:[%s1002_s0 + $0x8] sm:$0xff]  ;;  %v31_v3 = vld [vmem:[%s1002_s0 + $0x10] sm:$0xff] }
   0x2   :  { %v29_v1 = vld [vmem:[%s1002_s0] sm:$0xff]  ;;  %657 = vmatprep.subr.bf16.mxu0 %v724_v0  ;;  %v32_v5 = vld [vmem:[%s1002_s0 + $0x18] sm:$0xff]  ;;  %v34_v7 = vld [vmem:[%s1002_s0 + $0x28] sm:$0xff] }
   0x3   :  { %v45_v4 = vpack.c.bf16 %v30_v2, %v29_v1  ;;  %v33_v6 = vld [vmem:[%s1002_s0 + $0x20] sm:$0xff]  ;;  %658 = vmatpush3.bf16.msra.mxu0 %v724_v0  ;;  %v46_v8 = vpack.c.bf16 %v32_v5, %v31_v3  ;;  %v35_v10 = vld [vmem:[%s1002_s0 + $0x30] sm:$0xff]  ;;  %v36_v11 = vld [vmem:[%s1002_s0 + $0x38] sm:$0xff] }
   0x4   :  { %v47_v9 = vpack.c.bf16 %v34_v7, %v33_v6  ;;  %v37_v12 = vld [vmem:[%s1002_s0 + $0x40] sm:$0xff]  ;;  %v38_v13 = vld [vmem:[%s1002_s0 + $0x48] sm:$0xff]  ;;  %v48_v16 = vpack.c.bf16 %v36_v11, %v35_v10  ;;  %v727_v18 = vld [vmem:[%s1005_s3 + $0x10] sm:$0xff]  }
   0x5   :  { %659 = vmatprep.mubr.msk.bf16.mxu0 %vm68_vm0, %v45_v4  ;;  %v725_v14 = vld [vmem:[%s1005_s3] sm:$0xff]   ;;  %v726_v15 = vld [vmem:[%s1005_s3 + $0x8] sm:$0xff]   ;;  %v49_v17 = vpack.c.bf16 %v38_v13, %v37_v12 }
   0x6   :  { %660 = vmatmul.mubr.msk.bf16.vlgmr.msra.gmra.mrb[0].mxu0 %vm68_vm0, %v46_v8  ;;  %675 = vmatprep.subr.bf16.mxu0 %v725_v14 }
   0x7   :  { %663 = vmatprep.mubr.msk.bf16.mxu0 %vm68_vm0, %v47_v9  ;;  %707 = vmatprep.subr.bf16.mxu1 %v725_v14 }
   0x8   :  { %676 = vmatpush3.bf16.msra.mxu0 %v725_v14  ;;  %715 = vmatpush3.bf16.msra.mxu1 %v725_v14 }
   0x9   :  { %677 = vmatprep.subr.bf16.mxu0 %v726_v15  ;;  %708 = vmatprep.subr.bf16.mxu1 %v726_v15 }
   0xa   :  { %13 = vsyncpa [#allocation4], 0  ;;  %v39_v19 = vld [vmem:[%s1002_s0 + $0x50] sm:$0xff]  ;;  %v40_v20 = vld [vmem:[%s1002_s0 + $0x58] sm:$0xff]  ;;  %vm497_vm1 = vcmask 130112   ;;  %vm504_vm2 = vcmask 195712  }
   0xb   :  { %v41_v21 = vld [vmem:[%s1002_s0 + $0x60] sm:$0xff]  ;;  %v42_v22 = vld [vmem:[%s1002_s0 + $0x68] sm:$0xff]  ;;  %v728_v23 = vld [vmem:[%s1005_s3 + $0x18] sm:$0xff]   ;;  %v50_v24 = vpack.c.bf16 %v40_v20, %v39_v19  ;;  %vm511_vm3 = vcmask 261312   ;;  %vm518_vm4 = vcmask 326912   ;;  %vm525_vm5 = vcmask 392512  }
   0xc   :  { %716 = vmatpush3.bf16.msra.mxu1 %v726_v15  ;;  %678 = vmatpush3.bf16.msra.mxu0 %v726_v15  ;;  %v51_v25 = vpack.c.bf16 %v42_v22, %v41_v21  ;;  %v729_v26 = vld [vmem:[%s1005_s3 + $0x20] sm:$0xff]   ;;  %v43_v27 = vld [vmem:[%s1002_s0 + $0x70] sm:$0xff]  ;;  %v44_v28 = vld [vmem:[%s1002_s0 + $0x78] sm:$0xff]  ;;  %vm532_vm6 = vcmask 458112   ;;  %vm539_vm7 = vcmask 523712   ;;  %vm546_vm8 = vcmask 589312  }
   0xd   :  { %679 = vmatprep.subr.bf16.mxu0 %v727_v18  ;;  %709 = vmatprep.subr.bf16.mxu1 %v727_v18  ;;  %v730_v29 = vld [vmem:[%s1005_s3 + $0x28] sm:$0xff]   ;;  %v52_v30 = vpack.c.bf16 %v44_v28, %v43_v27  ;;  %v731_v31 = vld [vmem:[%s1005_s3 + $0x30] sm:$0xff]   ;;  %v732_v32 = vld [vmem:[%s1005_s3 + $0x38] sm:$0xff]   ;;  %vm553_vm9 = vcmask 654912   ;;  %vm560_vm10 = vcmask 720512   ;;  %vm567_vm11 = vcmask 786112  }
   0xe   :  { %664 = vmatmul.mubr.msk.bf16.gmra.mrb[4].mxu0 %vm68_vm0, %v48_v16  ;;  %v613_v33 = vld [vmem:[%s1004_s2] ss:$0 sm:$0xff]  ;;  %vm574_vm12 = vcmask 851712   ;;  %vm581_vm13 = vcmask 917312   ;;  %vm588_vm14 = vcmask 982912   ;;  %vm595_vm15 = vcmask 1048512  }
   0xf   :  { %667 = vmatprep.mubr.msk.bf16.mxu0 %vm68_vm0, %v49_v17  ;;  %v398_v28 = vld [vmem:[%s1007_s5] sm:$0x1] }
  0x10   :  { %717 = vmatpush3.bf16.msra.mxu1 %v727_v18  ;;  %680 = vmatpush3.bf16.msra.mxu0 %v727_v18 }
  0x11   :  { %710 = vmatprep.subr.bf16.mxu1 %v728_v23  ;;  %681 = vmatprep.subr.bf16.mxu0 %v728_v23 }
  0x14   :  { %718 = vmatpush3.bf16.msra.mxu1 %v728_v23  ;;  %682 = vmatpush3.bf16.msra.mxu0 %v728_v23 }
  0x15   :  { %683 = vmatprep.subr.bf16.mxu0 %v729_v26  ;;  %711 = vmatprep.subr.bf16.mxu1 %v729_v26 }
  0x16   :  { %668 = vmatmul.mubr.msk.bf16.gmra.mrb[8].mxu0 %vm68_vm0, %v50_v24 }
  0x17   :  { %671 = vmatprep.mubr.msk.bf16.mxu0 %vm68_vm0, %v51_v25 }
  0x18   :  { %719 = vmatpush3.bf16.msra.mxu1 %v729_v26  ;;  %684 = vmatpush3.bf16.msra.mxu0 %v729_v26  ;;  %v400_v26 = vlaneseq }
  0x19   :  { %712 = vmatprep.subr.bf16.mxu1 %v730_v29  ;;  %685 = vmatprep.subr.bf16.mxu0 %v730_v29 }
  0x1a   :  { %v885_v27 = vshrl.u32 %v400_v26, 7 }
  0x1c   :  { %720 = vmatpush3.bf16.msra.mxu1 %v730_v29  ;;  %686 = vmatpush3.bf16.msra.mxu0 %v730_v29  ;;  %v399_v29 = vunpack.c.l.bf16 %v398_v28 }
  0x1d   :  { %687 = vmatprep.subr.bf16.mxu0 %v731_v31  ;;  %713 = vmatprep.subr.bf16.mxu1 %v731_v31 }
  0x1e   :  { %672 = vmatmul.mubr.msk.bf16.gmra.mrb[12].mxu0 %vm68_vm0, %v52_v30  ;;  %v402_v30 = vsub.s32 0, %v885_v27 }
  0x20   :  { %688 = vmatpush3.bf16.msra.mxu0 %v731_v31  ;;  %721 = vmatpush3.bf16.msra.mxu1 %v731_v31  ;;  %v894_v31 = vld [vmem:[%s1006_s4] ss:$0 sm:$0xff] }
  0x21   :  { %689 = vmatprep.subr.bf16.mxu0 %v732_v32  ;;  %714 = vmatprep.subr.bf16.mxu1 %v732_v32 }
  0x24   :  { %690 = vmatpush3.bf16.msra.mxu0 %v732_v32  ;;  %722 = vmatpush3.bf16.msra.mxu1 %v732_v32 }
  0xd9   :  { %v661_v34 = vpop.f32.mrb[0].mxu0 }
  0xda   :  { %v136_v35 = vadd.f32 %v661_v34, %v613_v33  ;;  %v127_v36 = vpop.f32.mrb[1].mxu0 }
  0xdb   :  { %v128_v37 = vadd.f32 %v613_v33, %v127_v36  ;;  %v662_v38 = vpop.f32.mrb[2].mxu0 }
  0xdc   :  { %v139_v39 = vadd.f32 %v662_v38, %v613_v33  ;;  %v130_v40 = vpop.f32.mrb[3].mxu0  ;;  %v192_v42 = vmax.f32 %v136_v35, 0.0  ;;  %v897_v35 = vrot.slane %v399_v29, %v402_v30 }
  0xdd   :  { %v131_v41 = vadd.f32 %v613_v33, %v130_v40  ;;  %v190_v44 = vmax.f32 %v128_v37, 0.0 }
  0xde   :  { %v193_v43 = vmax.f32 %v139_v39, 0.0 }
  0xdf   :  { %v191_v45 = vmax.f32 %v131_v41, 0.0 }
  0xe0   :  { %v207_v46 = vpack.c.bf16 %v193_v43, %v192_v42 }
  0xe1   :  { %v206_v47 = vpack.c.bf16 %v191_v45, %v190_v44  ;;  %v665_v48 = vpop.f32.mrb[4].mxu0 }
  0xe2   :  { %v152_v49 = vadd.f32 %v665_v48, %v613_v33  ;;  %v143_v50 = vpop.f32.mrb[5].mxu0 }
  0xe3   :  { %v144_v51 = vadd.f32 %v613_v33, %v143_v50  ;;  %v666_v52 = vpop.f32.mrb[6].mxu0  ;;  %691 = vmatprep.mubr.bf16.mxu0 %v206_v47 }
  0xe4   :  { %v155_v53 = vadd.f32 %v666_v52, %v613_v33  ;;  %v146_v54 = vpop.f32.mrb[7].mxu0  ;;  %692 = vmatmul.mubr.bf16.vlgmr.msra.gmra.mrb[16].mxu0 %v207_v46  ;;  %v196_v56 = vmax.f32 %v152_v49, 0.0 }
  0xe5   :  { %v147_v55 = vadd.f32 %v613_v33, %v146_v54  ;;  %v194_v58 = vmax.f32 %v144_v51, 0.0 }
  0xe6   :  { %v197_v57 = vmax.f32 %v155_v53, 0.0 }
  0xe7   :  { %v195_v59 = vmax.f32 %v147_v55, 0.0 }
  0xe8   :  { %v209_v60 = vpack.c.bf16 %v197_v57, %v196_v56 }
  0xe9   :  { %v669_v61 = vpop.f32.mrb[8].mxu0  ;;  %v208_v62 = vpack.c.bf16 %v195_v59, %v194_v58 }
  0xea   :  { %v168_v63 = vadd.f32 %v669_v61, %v613_v33  ;;  %v159_v0 = vpop.f32.mrb[9].mxu0 }
  0xeb   :  { %v160_v1 = vadd.f32 %v613_v33, %v159_v0  ;;  %v670_v2 = vpop.f32.mrb[10].mxu0  ;;  %695 = vmatprep.mubr.bf16.mxu1 %v208_v62 }
  0xec   :  { %v171_v3 = vadd.f32 %v670_v2, %v613_v33  ;;  %v162_v4 = vpop.f32.mrb[11].mxu0  ;;  %696 = vmatmul.mubr.bf16.vlgmr.msra.gmra.mrb[0].mxu1 %v209_v60  ;;  %v200_v6 = vmax.f32 %v168_v63, 0.0 }
  0xed   :  { %v163_v5 = vadd.f32 %v613_v33, %v162_v4  ;;  %v198_v8 = vmax.f32 %v160_v1, 0.0 }
  0xee   :  { %v201_v7 = vmax.f32 %v171_v3, 0.0 }
  0xef   :  { %v199_v9 = vmax.f32 %v163_v5, 0.0 }
  0xf0   :  { %v211_v10 = vpack.c.bf16 %v201_v7, %v200_v6 }
  0xf1   :  { %v210_v11 = vpack.c.bf16 %v199_v9, %v198_v8  ;;  %v673_v12 = vpop.f32.mrb[12].mxu0 }
  0xf2   :  { %v184_v13 = vadd.f32 %v673_v12, %v613_v33  ;;  %v175_v14 = vpop.f32.mrb[13].mxu0 }
  0xf3   :  { %v176_v15 = vadd.f32 %v613_v33, %v175_v14  ;;  %v674_v16 = vpop.f32.mrb[14].mxu0  ;;  %699 = vmatprep.mubr.bf16.mxu1 %v210_v11 }
  0xf4   :  { %v187_v17 = vadd.f32 %v674_v16, %v613_v33  ;;  %v178_v18 = vpop.f32.mrb[15].mxu0  ;;  %700 = vmatmul.mubr.bf16.gmra.mrb[4].mxu1 %v211_v10  ;;  %v204_v20 = vmax.f32 %v184_v13, 0.0 }
  0xf5   :  { %v179_v19 = vadd.f32 %v613_v33, %v178_v18  ;;  %v202_v22 = vmax.f32 %v176_v15, 0.0 }
  0xf6   :  { %v205_v21 = vmax.f32 %v187_v17, 0.0 }
  0xf7   :  { %v203_v23 = vmax.f32 %v179_v19, 0.0 }
  0xf8   :  { %v213_v24 = vpack.c.bf16 %v205_v21, %v204_v20 }
  0xf9   :  { %v212_v25 = vpack.c.bf16 %v203_v23, %v202_v22 }
  0xfb   :  { %703 = vmatprep.mubr.bf16.mxu1 %v212_v25 }
  0xfc   :  { %704 = vmatmul.mubr.bf16.gmra.mrb[8].mxu1 %v213_v24 }
 0x1b7   :  { %v693_v32 = vpop.f32.mrb[16].mxu0 }
 0x1b8   :  { %v328_v33 = vadd.f32 %v693_v32, %v894_v31  ;;  %v319_v34 = vpop.f32.mrb[17].mxu0 }
 0x1b9   :  { %v320_v36 = vadd.f32 %v894_v31, %v319_v34  ;;  %v694_v37 = vpop.f32.mrb[18].mxu0 }
 0x1ba   :  { %v384_v38 = vmax.f32 %v328_v33, 0.0  ;;  %v331_v39 = vadd.f32 %v694_v37, %v894_v31  ;;  %v322_v40 = vpop.f32.mrb[19].mxu0  ;;  %v931_v37 = vand.u32 127, %v400_v26 }
 0x1bb   :  { %v382_v41 = vmax.f32 %v320_v36, 0.0  ;;  %v323_v42 = vadd.f32 %v894_v31, %v322_v40  ;;  %v937_v40 = vstv %s1008_s6  ;;  %s757_s6 = smov [#allocation3]  }
 0x1bc   :  { %v385_v43 = vmax.f32 %v331_v39, 0.0  ;;  %v406_v44 = vmul.f32 %v897_v35, %v384_v38  ;;  %v492_v38 = vadd.s32 4294967288, %v931_v37  ;;  %s605_s29 = sshll.u32 %s757_s6, 4  ;;  %s606_s29 = int_to_ptr.vmem [resolvable:$true] %s605_s29 }
 0x1bd   :  { %v383_v45 = vmax.f32 %v323_v42, 0.0  ;;  %v404_v46 = vmul.f32 %v897_v35, %v382_v41  ;;  %v499_v41 = vadd.s32 4294967280, %v931_v37  ;;  %s733_s30 = scalar_lea.vmem %s606_s29, 16  ;;  %s737_s8 = scalar_lea.vmem %s606_s29, 32 }
 0x1be   :  { %424 = vadd.xlane.f32.xlu1 %v406_v44  ;;  %v407_v50 = vmul.f32 %v897_v35, %v385_v43  ;;  %v495_v42 = vsub.s32 %v492_v38, %v885_v27  ;;  %p734_p0 = scmp.ne.s32.totalorder %s606_s29, %s733_s30  ;;  %p738_p1 = scmp.lt.s32.totalorder %s606_s29, %s606_s29 }
 0x1bf   :  { %v697_v47 = vpop.f32.mrb[0].mxu1  ;;  %420 = vadd.xlane.f32.xlu0 %v404_v46  ;;  %v405_v53 = vmul.f32 %v897_v35, %v383_v45  ;;  %v502_v46 = vsub.s32 %v499_v41, %v885_v27  ;;  %p739_p2 = scmp.lt.s32.totalorder %s737_s8, %s733_s30 }
 0x1c0   :  { %v344_v48 = vadd.f32 %v697_v47, %v894_v31  ;;  %v335_v49 = vpop.f32.mrb[1].mxu1  ;;  %v506_v47 = vadd.s32 4294967272, %v931_v37 }
 0x1c1   :  { %v336_v51 = vadd.f32 %v894_v31, %v335_v49  ;;  %v698_v52 = vpop.f32.mrb[2].mxu1  ;;  %p740_p3 = por %p739_p2, %p738_p1 }
 0x1c2   :  { %v388_v54 = vmax.f32 %v344_v48, 0.0  ;;  %v347_v55 = vadd.f32 %v698_v52, %v894_v31  ;;  %v338_v56 = vpop.f32.mrb[3].mxu1  ;;  %426 = vadd.xlane.f32.xlu1 %v407_v50  ;;  %v513_v50 = vadd.s32 4294967264, %v931_v37 }
 0x1c3   :  { %v339_v57 = vadd.f32 %v894_v31, %v338_v56  ;;  %422 = vadd.xlane.f32.xlu0 %v405_v53  ;;  %v386_v60 = vmax.f32 %v336_v51, 0.0  ;;  %v520_v53 = vadd.s32 4294967256, %v931_v37  ;;  %v509_v56 = vsub.s32 %v506_v47, %v885_v27  ;;  %p741_p4 = pnand %p740_p3, %p734_p0 }
 0x1c4   :  { %v389_v58 = vmax.f32 %v347_v55, 0.0  ;;  %v410_v59 = vmul.f32 %v897_v35, %v388_v54  ;;  %v527_v54 = vadd.s32 4294967248, %v931_v37 }
 0x1c5   :  { %v387_v61 = vmax.f32 %v339_v57, 0.0  ;;  %v408_v4 = vmul.f32 %v897_v35, %v386_v60  ;;  %v516_v60 = vsub.s32 %v513_v50, %v885_v27 }
 0x1c6   :  { %v411_v62 = vmul.f32 %v897_v35, %v389_v58 }
 0x1c7   :  { %v701_v63 = vpop.f32.mrb[4].mxu1  ;;  %432 = vadd.xlane.f32.xlu0 %v410_v59  ;;  %v409_v8 = vmul.f32 %v897_v35, %v387_v61  ;;  %v534_v61 = vadd.s32 4294967240, %v931_v37 }
 0x1c8   :  { %v360_v0 = vadd.f32 %v701_v63, %v894_v31  ;;  %v351_v1 = vpop.f32.mrb[5].mxu1  ;;  %434 = vadd.xlane.f32.xlu1 %v411_v62  ;;  %v523_v63 = vsub.s32 %v520_v53, %v885_v27 }
 0x1c9   :  { %v352_v2 = vadd.f32 %v894_v31, %v351_v1  ;;  %v702_v3 = vpop.f32.mrb[6].mxu1  ;;  %v530_v1 = vsub.s32 %v527_v54, %v885_v27 }
 0x1ca   :  { %v392_v5 = vmax.f32 %v360_v0, 0.0  ;;  %v363_v6 = vadd.f32 %v702_v3, %v894_v31  ;;  %v354_v7 = vpop.f32.mrb[7].mxu1 }
 0x1cb   :  { %v355_v9 = vadd.f32 %v894_v31, %v354_v7  ;;  %428 = vadd.xlane.f32.xlu0 %v408_v4  ;;  %v390_v12 = vmax.f32 %v352_v2, 0.0 }
 0x1cc   :  { %v393_v10 = vmax.f32 %v363_v6, 0.0  ;;  %430 = vadd.xlane.f32.xlu1 %v409_v8  ;;  %v414_v11 = vmul.f32 %v897_v35, %v392_v5  ;;  %v555_v6 = vadd.s32 4294967216, %v931_v37 }
 0x1cd   :  { %v391_v13 = vmax.f32 %v355_v9, 0.0  ;;  %v412_v20 = vmul.f32 %v897_v35, %v390_v12  ;;  %v541_v9 = vadd.s32 4294967232, %v931_v37 }
 0x1ce   :  { %v415_v14 = vmul.f32 %v897_v35, %v393_v10 }
 0x1cf   :  { %v705_v15 = vpop.f32.mrb[8].mxu1  ;;  %440 = vadd.xlane.f32.xlu0 %v414_v11  ;;  %v413_v22 = vmul.f32 %v897_v35, %v391_v13  ;;  %v562_v13 = vadd.s32 4294967208, %v931_v37 }
 0x1d0   :  { %v367_v16 = vpop.f32.mrb[9].mxu1  ;;  %442 = vadd.xlane.f32.xlu1 %v415_v14  ;;  %v376_v17 = vadd.f32 %v705_v15, %v894_v31  ;;  %v548_v14 = vadd.s32 4294967224, %v931_v37 }
 0x1d1   :  { %v368_v18 = vadd.f32 %v894_v31, %v367_v16  ;;  %v706_v19 = vpop.f32.mrb[10].mxu1 }
 0x1d2   :  { %v370_v21 = vpop.f32.mrb[11].mxu1  ;;  %v379_v24 = vadd.f32 %v706_v19, %v894_v31  ;;  %v396_v28 = vmax.f32 %v376_v17, 0.0  ;;  %v537_v17 = vsub.s32 %v534_v61, %v885_v27 }
 0x1d3   :  { %v394_v23 = vmax.f32 %v368_v18, 0.0  ;;  %v371_v25 = vadd.f32 %v894_v31, %v370_v21  ;;  %436 = vadd.xlane.f32.xlu0 %v412_v20  ;;  %v558_v21 = vsub.s32 %v555_v6, %v885_v27 }
 0x1d4   :  { %438 = vadd.xlane.f32.xlu1 %v413_v22  ;;  %v397_v32 = vmax.f32 %v379_v24, 0.0  ;;  %v418_v34 = vmul.f32 %v897_v35, %v396_v28  ;;  %v544_v22 = vsub.s32 %v541_v9, %v885_v27  ;;  %v565_v24 = vsub.s32 %v562_v13, %v885_v27 }
 0x1d5   :  { %v395_v29 = vmax.f32 %v371_v25, 0.0  ;;  %v416_v30 = vmul.f32 %v897_v35, %v394_v23  ;;  %v569_v23 = vadd.s32 4294967200, %v931_v37  ;;  %v551_v28 = vsub.s32 %v548_v14, %v885_v27 }
 0x1d6   :  { %v419_v36 = vmul.f32 %v897_v35, %v397_v32 }
 0x1d7   :  { %444 = vadd.xlane.f32.xlu0 %v416_v30  ;;  %v417_v33 = vmul.f32 %v897_v35, %v395_v29  ;;  %v490_v35 = vsub.s32 %v931_v37, %v885_v27  ;;  %v576_v29 = vadd.s32 4294967192, %v931_v37  ;;  %v572_v41 = vsub.s32 %v569_v23, %v885_v27 }
 0x1d9   :  { %446 = vadd.xlane.f32.xlu1 %v417_v33 }
 0x1db   :  { %448 = vadd.xlane.f32.xlu0 %v418_v34 }
 0x1dd   :  { %450 = vadd.xlane.f32.xlu1 %v419_v36 }
 0x24b   :  { %v425_v31 = vpop.xlane.xlu1 %424 }
 0x24c   :  { %v421_v39 = vpop.xlane.xlu0 %420  ;;  %v456_v48 = vadd.f32 %v937_v40, %v425_v31 }
 0x24d   :  { %v454_v43 = vadd.f32 %v937_v40, %v421_v39 }
 0x24e   :  { %v503_v59 = vrot.slane %v456_v48, %v502_v46  ;;  %v590_v48 = vadd.s32 4294967176, %v931_v37 }
 0x24f   :  { %v427_v44 = vpop.xlane.xlu1 %426  ;;  %v491_v51 = vrot.slane %v454_v43, %v490_v35 }
 0x250   :  { %v423_v26 = vpop.xlane.xlu0 %422  ;;  %v457_v57 = vadd.f32 %v937_v40, %v427_v44  ;;  %v579_v44 = vsub.s32 %v576_v29, %v885_v27 }
 0x251   :  { %v455_v45 = vadd.f32 %v937_v40, %v423_v26 }
 0x252   :  { %v510_v4 = vrot.slane %v457_v57, %v509_v56 }
 0x253   :  { %v496_v49 = vrot.slane %v455_v45, %v495_v42  ;;  %v583_v42 = vadd.s32 4294967184, %v931_v37  ;;  %v593_v37 = vsub.s32 %v590_v48, %v885_v27 }
 0x254   :  { %v433_v52 = vpop.xlane.xlu0 %432 }
 0x255   :  { %v435_v55 = vpop.xlane.xlu1 %434  ;;  %v498_v58 = vsel %vm497_vm1, %v496_v49, %v491_v51  ;;  %v460_v7 = vadd.f32 %v937_v40, %v433_v52 }
 0x256   :  { %v505_v0 = vsel %vm504_vm2, %v503_v59, %v498_v58  ;;  %v461_v18 = vadd.f32 %v937_v40, %v435_v55  ;;  %v586_v55 = vsub.s32 %v583_v42, %v885_v27 }
 0x257   :  { %v512_v10 = vsel %vm511_vm3, %v510_v4, %v505_v0  ;;  %v531_v20 = vrot.slane %v460_v7, %v530_v1 }
 0x258   :  { %v429_v62 = vpop.xlane.xlu0 %428  ;;  %v538_v36 = vrot.slane %v461_v18, %v537_v17 }
 0x259   :  { %v458_v2 = vadd.f32 %v937_v40, %v429_v62  ;;  %v431_v3 = vpop.xlane.xlu1 %430 }
 0x25a   :  { %v459_v5 = vadd.f32 %v937_v40, %v431_v3 }
 0x25b   :  { %v517_v8 = vrot.slane %v458_v2, %v516_v60 }
 0x25c   :  { %v524_v11 = vrot.slane %v459_v5, %v523_v63  ;;  %v441_v12 = vpop.xlane.xlu0 %440 }
 0x25d   :  { %v519_v15 = vsel %vm518_vm4, %v517_v8, %v512_v10  ;;  %v443_v16 = vpop.xlane.xlu1 %442  ;;  %v464_v32 = vadd.f32 %v937_v40, %v441_v12 }
 0x25e   :  { %v526_v19 = vsel %vm525_vm5, %v524_v11, %v519_v15  ;;  %v465_v31 = vadd.f32 %v937_v40, %v443_v16 }
 0x25f   :  { %v533_v30 = vsel %vm532_vm6, %v531_v20, %v526_v19  ;;  %v559_v45 = vrot.slane %v464_v32, %v558_v21 }
 0x260   :  { %v437_v25 = vpop.xlane.xlu0 %436  ;;  %v540_v35 = vsel %vm539_vm7, %v538_v36, %v533_v30  ;;  %v566_v49 = vrot.slane %v465_v31, %v565_v24 }
 0x261   :  { %v462_v33 = vadd.f32 %v937_v40, %v437_v25  ;;  %v439_v34 = vpop.xlane.xlu1 %438 }
 0x262   :  { %v463_v38 = vadd.f32 %v937_v40, %v439_v34 }
 0x263   :  { %v545_v39 = vrot.slane %v462_v33, %v544_v22 }
 0x264   :  { %v552_v43 = vrot.slane %v463_v38, %v551_v28  ;;  %v445_v26 = vpop.xlane.xlu0 %444 }
 0x265   :  { %v547_v46 = vsel %vm546_vm8, %v545_v39, %v540_v35  ;;  %v466_v47 = vadd.f32 %v937_v40, %v445_v26 }
 0x266   :  { %v554_v50 = vsel %vm553_vm9, %v552_v43, %v547_v46  ;;  %v447_v51 = vpop.xlane.xlu1 %446 }
 0x267   :  { %v561_v52 = vsel %vm560_vm10, %v559_v45, %v554_v50  ;;  %v573_v53 = vrot.slane %v466_v47, %v572_v41  ;;  %v467_v54 = vadd.f32 %v937_v40, %v447_v51 }
 0x268   :  { %v568_v56 = vsel %vm567_vm11, %v566_v49, %v561_v52  ;;  %v449_v57 = vpop.xlane.xlu0 %448 }
 0x269   :  { %v575_v58 = vsel %vm574_vm12, %v573_v53, %v568_v56  ;;  %v580_v59 = vrot.slane %v467_v54, %v579_v44  ;;  %v468_v60 = vadd.f32 %v937_v40, %v449_v57 }
 0x26a   :  { %v451_v61 = vpop.xlane.xlu1 %450 }
 0x26b   :  { %v587_v62 = vrot.slane %v468_v60, %v586_v55  ;;  %v469_v63 = vadd.f32 %v937_v40, %v451_v61  ;;  %v582_v0 = vsel %vm581_vm13, %v580_v59, %v575_v58 }
 0x26d   :  { %v594_v1 = vrot.slane %v469_v63, %v593_v37  ;;  %v589_v2 = vsel %vm588_vm14, %v587_v62, %v582_v0 }
 0x26f   :  { %v596_v3 = vsel %vm595_vm15, %v594_v1, %v589_v2 }
 0x270   :  { %598 = vst [vmem:[#allocation3] sm:$0x1] %v596_v3 }
 0x271   :  { %744 = shalt.err (!%p741_p4)
}
 0x272   :  { %s745_s1 = scalar_lea.hbm %s1009_s7, 16 }
 0x273   :  { %p746_p5 = scmp.ne.s32.totalorder %s1009_s7, %s745_s1  ;;  %p749_p6 = scmp.lt.u32.totalorder %s745_s1, %s1009_s7 }
 0x275   :  { %p751_p7 = pnand %p749_p6, %p746_p5 }
 0x277   :  { %754 = shalt.err (!%p751_p7)
}
 0x278   :  { %608 = dma.vmem_to_hbm [thread:$0]  %s606_s29, 16, %s1009_s7, [#allocation4]  }
 0x279   :  { %755 = dma.done.wait [#allocation4], 16  }
 0x27a   :  { %756 = vsyncadd [#allocation4], 4294967280 }
 0x27b   :  { %612 = vsyncpa [#allocation4], 1 }

</bundles_post_ra>
